<compile_context>
chip_gen: v6e
topology: v6e:2x2x1
jax: 0.10.0
libtpu: 0.0.40
codegen_flags: <defaults>
</compile_context>

<pallas_src>
import functools
import math

import jax
import jax.numpy as jnp
from jax.experimental import pallas as pl
from jax.experimental.pallas import tpu as pltpu


_INV_SQRT2 = 0.7071067811865476
_LANE = 128
_HIDDEN_CHUNK_BUDGET = 8 * 1024 * 1024  # cap on live hidden-chunk bytes in VMEM


def _round_up(n, m):
    return ((n + m - 1) // m) * m


def _erf(z):
    # Abramowitz & Stegun 7.1.26 (max abs err ~1.5e-7), built only from ops
    # with guaranteed Mosaic lowerings (exp, mul, add, div, where, abs).
    a1, a2, a3, a4, a5 = (0.254829592, -0.284496736, 1.421413741,
                          -1.453152027, 1.061405429)
    p = 0.3275911
    s = jnp.where(z >= 0.0, 1.0, -1.0)
    az = jnp.abs(z)
    t = 1.0 / (1.0 + p * az)
    poly = t * (a1 + t * (a2 + t * (a3 + t * (a4 + t * a5))))
    return s * (1.0 - poly * jnp.exp(-az * az))


def _gelu(x, approximate):
    if approximate:
        # tanh-approx GELU -> transcendental goes to the EUP slot, overlapping
        # with MXU work (perf path).
        return jax.nn.gelu(x, approximate=True)
    # Exact erf formulation == PyTorch nn.GELU() default semantics.
    return 0.5 * x * (1.0 + _erf(x * _INV_SQRT2))


# ----------------------------- kernel ----------------------------------------


def deepsub_kernel(x_ref, w1_ref, b1_ref, w2_ref, b2_ref, o_ref, *,
                   r_chunk, approximate_gelu, mxu_dtype):
    # Cast to the MXU operand dtype inside the kernel; x streams from HBM in
    # its original dtype (no wrapper-side cast/pad pass over the activation).
    x = x_ref[...].astype(mxu_dtype)                       # (tm, D_in)
    r_total = w1_ref.shape[1]

    acc = None
    # Chunk the hidden dimension so the live f32 hidden stays small; for
    # typical DeepSub ranks there is exactly one chunk.
    for r0 in range(0, r_total, r_chunk):
        rc = min(r_chunk, r_total - r0)
        h = jnp.dot(x, w1_ref[:, r0:r0 + rc],
                    preferred_element_type=jnp.float32)    # (tm, rc) f32
        h = h + b1_ref[:, r0:r0 + rc]                      # f32 bias
        h = _gelu(h, approximate_gelu)                     # f32 activation
        part = jnp.dot(h.astype(mxu_dtype), w2_ref[r0:r0 + rc, :],
                       preferred_element_type=jnp.float32)  # (tm, D_out_p)
        acc = part if acc is None else acc + part

    o_ref[...] = (acc + b2_ref[...]).astype(o_ref.dtype)


# -------------------------- parameter prep (once) ----------------------------


def prepare_deepsub_params(w1, b1, w2, b2, *, compute_dtype=jnp.bfloat16):
    """Cast + lane-pad DeepSub weights ONCE (outside the per-call path).

    w1: (D_in, R); b1: (R,); w2: (R, D_out); b2: (D_out,).
    Weight layout is (in, out), i.e. transposed w.r.t. torch Linear.weight.
    Padding is mathematically exact: gelu(0) == 0 and padded columns/rows are
    either sliced off or multiply zero rows.
    """
    D_in, R = w1.shape
    D_out = w2.shape[1]
    R_p = _round_up(R, _LANE)
    D_out_p = _round_up(D_out, _LANE)

    w1c = w1.astype(compute_dtype)
    w2c = w2.astype(compute_dtype)
    b1f = b1.astype(jnp.float32).reshape(1, R)
    b2f = b2.astype(jnp.float32).reshape(1, D_out)

    if R_p != R:
        w1c = jnp.pad(w1c, ((0, 0), (0, R_p - R)))
        b1f = jnp.pad(b1f, ((0, 0), (0, R_p - R)))
        w2c = jnp.pad(w2c, ((0, R_p - R), (0, 0)))
    if D_out_p != D_out:
        w2c = jnp.pad(w2c, ((0, 0), (0, D_out_p - D_out)))
        b2f = jnp.pad(b2f, ((0, 0), (0, D_out_p - D_out)))

    return dict(w1=w1c, b1=b1f, w2=w2c, b2=b2f,
                d_in=D_in, r=R, r_p=R_p, d_out=D_out, d_out_p=D_out_p,
                compute_dtype=compute_dtype)


def _chip_info():
    """(vmem_limit_bytes, has_two_tensorcores) for the current chip."""
    vmem_cap = None
    try:
        vmem_cap = int(pltpu.get_tpu_info().vmem_capacity_bytes)
    except Exception:
        vmem_cap = None
    kind = ""
    try:
        kind = jax.devices()[0].device_kind.lower()
    except Exception:
        kind = ""
    if vmem_cap is None:
        # Conservative fallback: 64 MiB class unless we know it's a 128 MiB chip.
        vmem_cap = 128 * 1024 * 1024 if ("v5" in kind or "v6" in kind) \
            else 64 * 1024 * 1024
    # Leave headroom for compiler-internal scratch.
    vmem_limit = min(int(0.875 * vmem_cap), vmem_cap - 8 * 1024 * 1024)
    two_tc = ("v7" in kind) or ("v4" in kind)
    return vmem_limit, two_tc


# ------------------------------ forward --------------------------------------


def deepsub_forward(x, params, *, tm=None, approximate_gelu=True,
                    out_dtype=None):
    """Fused DeepSub forward: gelu(x @ W1 + b1) @ W2 + b2.

    x: (M, D_in) in its original dtype (cast to the MXU dtype inside the
    kernel).  `params` comes from prepare_deepsub_params().
    """
    M, D_in = x.shape
    assert D_in == params["d_in"], "input feature dim mismatch"
    compute_dtype = params["compute_dtype"]
    R_p, D_out, D_out_p = params["r_p"], params["d_out"], params["d_out_p"]
    out_dtype = x.dtype if out_dtype is None else out_dtype

    x_bytes = jnp.dtype(x.dtype).itemsize
    o_bytes = jnp.dtype(out_dtype).itemsize
    c_bytes = jnp.dtype(compute_dtype).itemsize
    sub = 8 if x_bytes >= 4 else 16          # sublane packing of the row tile

    vmem_limit, two_tc = _chip_info()
    budget = int(0.85 * vmem_limit)

    def pick_r_chunk(tile_m):
        # f32 hidden chunk + its MXU-dtype copy, capped at _HIDDEN_CHUNK_BUDGET.
        per_row = 4 + c_bytes
        max_rc = _HIDDEN_CHUNK_BUDGET // max(1, tile_m * per_row)
        max_rc = max(_LANE, (max_rc // _LANE) * _LANE)
        return min(R_p, max_rc)

    def vmem_footprint(tile_m):
        rc = pick_r_chunk(tile_m)
        # Resident weights/biases are single-buffered (Buffered(1)): count 1x.
        resident = (D_in * R_p + R_p * D_out_p) * c_bytes + (R_p + D_out_p) * 4
        streamed = 2 * tile_m * D_in * x_bytes + 2 * tile_m * D_out_p * o_bytes
        live = tile_m * (rc * (4 + c_bytes) + D_out_p * 4)
        return resident + streamed + live

    # --- row tile selection ---------------------------------------------------
    if tm is None:
        tm = 512                              # multiple of 256: full MXU passes
    tm = max(sub, min(_round_up(tm, sub), _round_up(M, sub)))

    # Step down in 256/128 increments (not halving) until the footprint fits.
    while vmem_footprint(tm) > budget and tm > sub:
        if tm > 256:
            tm -= 256
        elif tm > 128:
            tm -= 128
        else:
            tm = max(sub, _round_up(tm // 2, sub))
        tm = max(sub, _round_up(tm, sub))
    # TODO(synk): K/N grid tiling of W1/W2 (pl.when-managed accumulator) when
    # the resident weights alone exceed VMEM, and optional fp8 weight operands
    # on v7x; not needed for typical DeepSub ranks.

    # On 2-TensorCore chips keep an even number of row tiles so both cores get
    # equal work; single-TC chips (v5e/v6e) skip the split (pure overhead).
    if two_tc and M > sub:
        ntiles = pl.cdiv(M, tm)
        if ntiles % 2 == 1:
            tm = max(sub, _round_up(pl.cdiv(M, ntiles + 1), sub))

    r_chunk = pick_r_chunk(tm)
    grid = (pl.cdiv(M, tm),)                  # ragged last tile handled by Pallas

    kernel = functools.partial(deepsub_kernel, r_chunk=r_chunk,
                               approximate_gelu=approximate_gelu,
                               mxu_dtype=compute_dtype)

    def _launch(single_buffer_weights):
        if single_buffer_weights:
            res_kwargs = {"pipeline_mode": pl.Buffered(1)}
        else:
            res_kwargs = {}

        def resident_spec(shape):
            return pl.BlockSpec(shape, lambda i: (0, 0), **res_kwargs)

        return pl.pallas_call(
            kernel,
            out_shape=jax.ShapeDtypeStruct((M, D_out_p), out_dtype),
            grid_spec=pltpu.PrefetchScalarGridSpec(
                num_scalar_prefetch=0,
                grid=grid,
                in_specs=[
                    pl.BlockSpec((tm, D_in), lambda i: (i, 0)),      # x (raw)
                    resident_spec((D_in, R_p)),                      # W1
                    resident_spec((1, R_p)),                         # b1 (f32)
                    resident_spec((R_p, D_out_p)),                   # W2
                    resident_spec((1, D_out_p)),                     # b2 (f32)
                ],
                out_specs=pl.BlockSpec((tm, D_out_p), lambda i: (i, 0)),
            ),
            compiler_params=pltpu.CompilerParams(
                dimension_semantics=("parallel",),
                vmem_limit_bytes=vmem_limit,
            ),
        )(x, params["w1"], params["b1"], params["w2"], params["b2"])

    try:
        out = _launch(True)
    except Exception:
        # Fallback if this JAX build rejects Buffered(1) resident operands.
        out = _launch(False)

    # Slice lanes only when padding was actually applied (no extra HBM pass
    # otherwise); rows never need slicing since M is never padded.
    if D_out_p != D_out:
        out = out[:, :D_out]
    return out


# ------------------------------- demo ----------------------------------------


def _init_linear_params(key, in_features, out_features, dtype=jnp.float32):
    # Mimic torch.nn.Linear default init: U(-k, k), k = 1/sqrt(in_features).
    kw, kb = jax.random.split(key)
    bound = 1.0 / math.sqrt(in_features)
    # Stored as (in, out): transpose of PyTorch's (out, in) weight.
    w = jax.random.uniform(kw, (in_features, out_features), dtype,
                           minval=-bound, maxval=bound)
    b = jax.random.uniform(kb, (out_features,), dtype,
                           minval=-bound, maxval=bound)
    return w, b


if __name__ == "__main__":
    input_dim, inner_rank, output_dim = 32, 64, 32
    batch = 8

    key = jax.random.PRNGKey(0)
    kx, k1, k2 = jax.random.split(key, 3)

    x = jax.random.normal(kx, (batch, input_dim), jnp.float32)
    w1, b1 = _init_linear_params(k1, input_dim, inner_rank)
    w2, b2 = _init_linear_params(k2, inner_rank, output_dim)

    # Plain-JAX reference (exact erf GELU == PyTorch nn.GELU() default).
    def reference(xx):
        h = jnp.dot(xx, w1, precision=jax.lax.Precision.HIGHEST) + b1
        h = jax.nn.gelu(h, approximate=False)
        return jnp.dot(h, w2, precision=jax.lax.Precision.HIGHEST) + b2

    y_ref = reference(x)

    # 1) f32-operand path with exact GELU: structural / padding check.
    params_f32 = prepare_deepsub_params(w1, b1, w2, b2,
                                        compute_dtype=jnp.float32)
    out_f32 = jax.block_until_ready(
        deepsub_forward(x, params_f32, approximate_gelu=False))
    assert out_f32.shape == (batch, output_dim)
    assert jnp.allclose(out_f32, y_ref, atol=3e-2, rtol=3e-2)

    # 2) default perf path: bf16 MXU operands, f32 accumulation, EUP GELU.
    params = prepare_deepsub_params(w1, b1, w2, b2)
    out_bf16 = jax.block_until_ready(deepsub_forward(x, params))
    assert out_bf16.shape == (batch, output_dim)
    assert jnp.allclose(out_bf16, y_ref, atol=5e-2, rtol=5e-2)

    # 3) ragged batch (M not a multiple of the row tile): partial last block.
    x_ragged = jax.random.normal(k2, (13, input_dim), jnp.float32)
    out_r = jax.block_until_ready(deepsub_forward(x_ragged, params))
    assert out_r.shape == (13, output_dim)
    assert jnp.allclose(out_r, reference(x_ragged), atol=5e-2, rtol=5e-2)

    print("KERNEL_OK")
</pallas_src>

<mosaic_0001>
module attributes {stable_mosaic.version = 11 : i64} {
  func.func @deepsub_kernel(%arg0: i32, %arg1: memref<8x32xf32, #tpu.memory_space<vmem>>, %arg2: memref<32x128xf32, #tpu.memory_space<vmem>>, %arg3: memref<1x128xf32, #tpu.memory_space<vmem>>, %arg4: memref<128x128xf32, #tpu.memory_space<vmem>>, %arg5: memref<1x128xf32, #tpu.memory_space<vmem>>, %arg6: memref<8x128xf32, #tpu.memory_space<vmem>>) attributes {dimension_semantics = [#tpu.dimension_semantics<parallel>], iteration_bounds = array<i64: 1>, scalar_prefetch = 0 : i64, scratch_operands = 0 : i64, tpu.core_type = #tpu.core_type<tc>, window_params = [{transform_indices = @transform_0, window_bounds = array<i64: 8, 32>}, {pipeline_mode = #tpu.pipeline_mode<synchronous>, transform_indices = @transform_1, window_bounds = array<i64: 32, 128>}, {pipeline_mode = #tpu.pipeline_mode<synchronous>, transform_indices = @transform_2, window_bounds = array<i64: 1, 128>}, {pipeline_mode = #tpu.pipeline_mode<synchronous>, transform_indices = @transform_3, window_bounds = array<i64: 128, 128>}, {pipeline_mode = #tpu.pipeline_mode<synchronous>, transform_indices = @transform_4, window_bounds = array<i64: 1, 128>}, {transform_indices = @transform_5, window_bounds = array<i64: 8, 128>}]} {
    %c0 = arith.constant 0 : index
    %c0_0 = arith.constant 0 : index
    %0 = vector.load %arg1[%c0, %c0_0] : memref<8x32xf32, #tpu.memory_space<vmem>>, vector<8x32xf32>
    %c0_1 = arith.constant 0 : index
    %c0_2 = arith.constant 0 : index
    %1 = vector.load %arg2[%c0_1, %c0_2] : memref<32x128xf32, #tpu.memory_space<vmem>>, vector<32x128xf32>
    %cst = arith.constant dense<0.000000e+00> : vector<8x128xf32>
    %2 = tpu.matmul %0, %1, %cst {dimension_numbers = #tpu.dot_dimension_numbers<[1], [0], [0], [1], [0, 0, 1, 1], [], []>} : vector<8x32xf32>, vector<32x128xf32>, vector<8x128xf32> -> vector<8x128xf32>
    %c0_3 = arith.constant 0 : index
    %c0_4 = arith.constant 0 : index
    %3 = vector.load %arg3[%c0_3, %c0_4] : memref<1x128xf32, #tpu.memory_space<vmem>>, vector<1x128xf32>
    %4 = vector.broadcast %3 : vector<1x128xf32> to vector<8x128xf32>
    %5 = arith.addf %2, %4 : vector<8x128xf32>
    %cst_5 = arith.constant 5.000000e-01 : f32
    %6 = vector.broadcast %cst_5 : f32 to vector<8x128xf32>
    %7 = arith.mulf %6, %5 : vector<8x128xf32>
    %cst_6 = arith.constant 0.707106769 : f32
    %8 = vector.broadcast %cst_6 : f32 to vector<8x128xf32>
    %9 = arith.mulf %5, %8 : vector<8x128xf32>
    %cst_7 = arith.constant 0.000000e+00 : f32
    %10 = vector.broadcast %cst_7 : f32 to vector<8x128xf32>
    %11 = arith.cmpf oge, %9, %10 : vector<8x128xf32>
    %cst_8 = arith.constant 1.000000e+00 : f32
    %cst_9 = arith.constant -1.000000e+00 : f32
    %12 = vector.broadcast %cst_8 : f32 to vector<8x128xf32>
    %13 = vector.broadcast %cst_9 : f32 to vector<8x128xf32>
    %14 = arith.select %11, %12, %13 : vector<8x128xi1>, vector<8x128xf32>
    %15 = math.absf %9 : vector<8x128xf32>
    %cst_10 = arith.constant 0.327591091 : f32
    %16 = vector.broadcast %cst_10 : f32 to vector<8x128xf32>
    %17 = arith.mulf %16, %15 : vector<8x128xf32>
    %cst_11 = arith.constant 1.000000e+00 : f32
    %18 = vector.broadcast %cst_11 : f32 to vector<8x128xf32>
    %19 = arith.addf %18, %17 : vector<8x128xf32>
    %cst_12 = arith.constant 1.000000e+00 : f32
    %20 = vector.broadcast %cst_12 : f32 to vector<8x128xf32>
    %21 = arith.divf %20, %19 : vector<8x128xf32>
    %cst_13 = arith.constant 1.06140542 : f32
    %22 = vector.broadcast %cst_13 : f32 to vector<8x128xf32>
    %23 = arith.mulf %21, %22 : vector<8x128xf32>
    %cst_14 = arith.constant -1.45315206 : f32
    %24 = vector.broadcast %cst_14 : f32 to vector<8x128xf32>
    %25 = arith.addf %24, %23 : vector<8x128xf32>
    %26 = arith.mulf %21, %25 : vector<8x128xf32>
    %cst_15 = arith.constant 1.42141378 : f32
    %27 = vector.broadcast %cst_15 : f32 to vector<8x128xf32>
    %28 = arith.addf %27, %26 : vector<8x128xf32>
    %29 = arith.mulf %21, %28 : vector<8x128xf32>
    %cst_16 = arith.constant -0.284496725 : f32
    %30 = vector.broadcast %cst_16 : f32 to vector<8x128xf32>
    %31 = arith.addf %30, %29 : vector<8x128xf32>
    %32 = arith.mulf %21, %31 : vector<8x128xf32>
    %cst_17 = arith.constant 0.254829586 : f32
    %33 = vector.broadcast %cst_17 : f32 to vector<8x128xf32>
    %34 = arith.addf %33, %32 : vector<8x128xf32>
    %35 = arith.mulf %21, %34 : vector<8x128xf32>
    %cst_18 = arith.constant 0.000000e+00 : f32
    %36 = vector.broadcast %cst_18 : f32 to vector<8x128xf32>
    %37 = arith.subf %36, %15 : vector<8x128xf32>
    %38 = arith.mulf %37, %15 : vector<8x128xf32>
    %39 = math.exp %38 : vector<8x128xf32>
    %40 = arith.mulf %35, %39 : vector<8x128xf32>
    %cst_19 = arith.constant 1.000000e+00 : f32
    %41 = vector.broadcast %cst_19 : f32 to vector<8x128xf32>
    %42 = arith.subf %41, %40 : vector<8x128xf32>
    %43 = arith.mulf %14, %42 : vector<8x128xf32>
    %cst_20 = arith.constant 1.000000e+00 : f32
    %44 = vector.broadcast %cst_20 : f32 to vector<8x128xf32>
    %45 = arith.addf %44, %43 : vector<8x128xf32>
    %46 = arith.mulf %7, %45 : vector<8x128xf32>
    %c0_21 = arith.constant 0 : index
    %c0_22 = arith.constant 0 : index
    %47 = vector.load %arg4[%c0_21, %c0_22] : memref<128x128xf32, #tpu.memory_space<vmem>>, vector<128x128xf32>
    %cst_23 = arith.constant dense<0.000000e+00> : vector<8x128xf32>
    %48 = tpu.matmul %46, %47, %cst_23 {dimension_numbers = #tpu.dot_dimension_numbers<[1], [0], [0], [1], [0, 0, 1, 1], [], []>} : vector<8x128xf32>, vector<128x128xf32>, vector<8x128xf32> -> vector<8x128xf32>
    %c0_24 = arith.constant 0 : index
    %c0_25 = arith.constant 0 : index
    %49 = vector.load %arg5[%c0_24, %c0_25] : memref<1x128xf32, #tpu.memory_space<vmem>>, vector<1x128xf32>
    %50 = vector.broadcast %49 : vector<1x128xf32> to vector<8x128xf32>
    %51 = arith.addf %48, %50 : vector<8x128xf32>
    %c0_26 = arith.constant 0 : index
    %c0_27 = arith.constant 0 : index
    %52 = vector.load %arg6[%c0_26, %c0_27] : memref<8x128xf32, #tpu.memory_space<vmem>>, vector<8x128xf32>
    tpu.vector_store %arg6[%c0_26, %c0_27], %51 {strides = array<i32>} : memref<8x128xf32, #tpu.memory_space<vmem>>, vector<8x128xf32>,
    return
  }
  func.func @transform_0(%arg0: i32) -> (i32, i32) {
    %c0_i32 = arith.constant 0 : i32
    %c0_i32_0 = arith.constant 0 : i32
    return %arg0, %c0_i32 : i32, i32
  }
  func.func @transform_1(%arg0: i32) -> (i32, i32) {
    %c0_i32 = arith.constant 0 : i32
    %c0_i32_0 = arith.constant 0 : i32
    %c0_i32_1 = arith.constant 0 : i32
    return %c0_i32, %c0_i32_0 : i32, i32
  }
  func.func @transform_2(%arg0: i32) -> (i32, i32) {
    %c0_i32 = arith.constant 0 : i32
    %c0_i32_0 = arith.constant 0 : i32
    %c0_i32_1 = arith.constant 0 : i32
    return %c0_i32, %c0_i32_0 : i32, i32
  }
  func.func @transform_3(%arg0: i32) -> (i32, i32) {
    %c0_i32 = arith.constant 0 : i32
    %c0_i32_0 = arith.constant 0 : i32
    %c0_i32_1 = arith.constant 0 : i32
    return %c0_i32, %c0_i32_0 : i32, i32
  }
  func.func @transform_4(%arg0: i32) -> (i32, i32) {
    %c0_i32 = arith.constant 0 : i32
    %c0_i32_0 = arith.constant 0 : i32
    %c0_i32_1 = arith.constant 0 : i32
    return %c0_i32, %c0_i32_0 : i32, i32
  }
  func.func @transform_5(%arg0: i32) -> (i32, i32) {
    %c0_i32 = arith.constant 0 : i32
    %c0_i32_0 = arith.constant 0 : i32
    return %arg0, %c0_i32 : i32, i32
  }
}

module attributes {stable_mosaic.version = 11 : i64} {
  func.func @deepsub_kernel(%arg0: i32, %arg1: memref<8x32xf32, #tpu.memory_space<vmem>>, %arg2: memref<32x128xf32, #tpu.memory_space<vmem>>, %arg3: memref<1x128xf32, #tpu.memory_space<vmem>>, %arg4: memref<128x128xf32, #tpu.memory_space<vmem>>, %arg5: memref<1x128xf32, #tpu.memory_space<vmem>>, %arg6: memref<8x128xf32, #tpu.memory_space<vmem>>) attributes {dimension_semantics = [#tpu.dimension_semantics<parallel>], iteration_bounds = array<i64: 1>, scalar_prefetch = 0 : i64, scratch_operands = 0 : i64, tpu.core_type = #tpu.core_type<tc>, window_params = [{transform_indices = @transform_0, window_bounds = array<i64: 8, 32>}, {pipeline_mode = #tpu.pipeline_mode<synchronous>, transform_indices = @transform_1, window_bounds = array<i64: 32, 128>}, {pipeline_mode = #tpu.pipeline_mode<synchronous>, transform_indices = @transform_2, window_bounds = array<i64: 1, 128>}, {pipeline_mode = #tpu.pipeline_mode<synchronous>, transform_indices = @transform_3, window_bounds = array<i64: 128, 128>}, {pipeline_mode = #tpu.pipeline_mode<synchronous>, transform_indices = @transform_4, window_bounds = array<i64: 1, 128>}, {transform_indices = @transform_5, window_bounds = array<i64: 8, 128>}]} {
    %c0 = arith.constant 0 : index
    %c0_0 = arith.constant 0 : index
    %0 = vector.load %arg1[%c0, %c0_0] : memref<8x32xf32, #tpu.memory_space<vmem>>, vector<8x32xf32>
    %c0_1 = arith.constant 0 : index
    %c0_2 = arith.constant 0 : index
    %1 = vector.load %arg2[%c0_1, %c0_2] : memref<32x128xf32, #tpu.memory_space<vmem>>, vector<32x128xf32>
    %cst = arith.constant dense<0.000000e+00> : vector<8x128xf32>
    %2 = tpu.matmul %0, %1, %cst {dimension_numbers = #tpu.dot_dimension_numbers<[1], [0], [0], [1], [0, 0, 1, 1], [], []>} : vector<8x32xf32>, vector<32x128xf32>, vector<8x128xf32> -> vector<8x128xf32>
    %c0_3 = arith.constant 0 : index
    %c0_4 = arith.constant 0 : index
    %3 = vector.load %arg3[%c0_3, %c0_4] : memref<1x128xf32, #tpu.memory_space<vmem>>, vector<1x128xf32>
    %4 = vector.broadcast %3 : vector<1x128xf32> to vector<8x128xf32>
    %5 = arith.addf %2, %4 : vector<8x128xf32>
    %cst_5 = arith.constant 5.000000e-01 : f32
    %6 = vector.broadcast %cst_5 : f32 to vector<8x128xf32>
    %7 = arith.mulf %6, %5 : vector<8x128xf32>
    %cst_6 = arith.constant 0.707106769 : f32
    %8 = vector.broadcast %cst_6 : f32 to vector<8x128xf32>
    %9 = arith.mulf %5, %8 : vector<8x128xf32>
    %cst_7 = arith.constant 0.000000e+00 : f32
    %10 = vector.broadcast %cst_7 : f32 to vector<8x128xf32>
    %11 = arith.cmpf oge, %9, %10 : vector<8x128xf32>
    %cst_8 = arith.constant 1.000000e+00 : f32
    %cst_9 = arith.constant -1.000000e+00 : f32
    %12 = vector.broadcast %cst_8 : f32 to vector<8x128xf32>
    %13 = vector.broadcast %cst_9 : f32 to vector<8x128xf32>
    %14 = arith.select %11, %12, %13 : vector<8x128xi1>, vector<8x128xf32>
    %15 = math.absf %9 : vector<8x128xf32>
    %cst_10 = arith.constant 0.327591091 : f32
    %16 = vector.broadcast %cst_10 : f32 to vector<8x128xf32>
    %17 = arith.mulf %16, %15 : vector<8x128xf32>
    %cst_11 = arith.constant 1.000000e+00 : f32
    %18 = vector.broadcast %cst_11 : f32 to vector<8x128xf32>
    %19 = arith.addf %18, %17 : vector<8x128xf32>
    %cst_12 = arith.constant 1.000000e+00 : f32
    %20 = vector.broadcast %cst_12 : f32 to vector<8x128xf32>
    %21 = arith.divf %20, %19 : vector<8x128xf32>
    %cst_13 = arith.constant 1.06140542 : f32
    %22 = vector.broadcast %cst_13 : f32 to vector<8x128xf32>
    %23 = arith.mulf %21, %22 : vector<8x128xf32>
    %cst_14 = arith.constant -1.45315206 : f32
    %24 = vector.broadcast %cst_14 : f32 to vector<8x128xf32>
    %25 = arith.addf %24, %23 : vector<8x128xf32>
    %26 = arith.mulf %21, %25 : vector<8x128xf32>
    %cst_15 = arith.constant 1.42141378 : f32
    %27 = vector.broadcast %cst_15 : f32 to vector<8x128xf32>
    %28 = arith.addf %27, %26 : vector<8x128xf32>
    %29 = arith.mulf %21, %28 : vector<8x128xf32>
    %cst_16 = arith.constant -0.284496725 : f32
    %30 = vector.broadcast %cst_16 : f32 to vector<8x128xf32>
    %31 = arith.addf %30, %29 : vector<8x128xf32>
    %32 = arith.mulf %21, %31 : vector<8x128xf32>
    %cst_17 = arith.constant 0.254829586 : f32
    %33 = vector.broadcast %cst_17 : f32 to vector<8x128xf32>
    %34 = arith.addf %33, %32 : vector<8x128xf32>
    %35 = arith.mulf %21, %34 : vector<8x128xf32>
    %cst_18 = arith.constant 0.000000e+00 : f32
    %36 = vector.broadcast %cst_18 : f32 to vector<8x128xf32>
    %37 = arith.subf %36, %15 : vector<8x128xf32>
    %38 = arith.mulf %37, %15 : vector<8x128xf32>
    %39 = math.exp %38 : vector<8x128xf32>
    %40 = arith.mulf %35, %39 : vector<8x128xf32>
    %cst_19 = arith.constant 1.000000e+00 : f32
    %41 = vector.broadcast %cst_19 : f32 to vector<8x128xf32>
    %42 = arith.subf %41, %40 : vector<8x128xf32>
    %43 = arith.mulf %14, %42 : vector<8x128xf32>
    %cst_20 = arith.constant 1.000000e+00 : f32
    %44 = vector.broadcast %cst_20 : f32 to vector<8x128xf32>
    %45 = arith.addf %44, %43 : vector<8x128xf32>
    %46 = arith.mulf %7, %45 : vector<8x128xf32>
    %c0_21 = arith.constant 0 : index
    %c0_22 = arith.constant 0 : index
    %47 = vector.load %arg4[%c0_21, %c0_22] : memref<128x128xf32, #tpu.memory_space<vmem>>, vector<128x128xf32>
    %cst_23 = arith.constant dense<0.000000e+00> : vector<8x128xf32>
    %48 = tpu.matmul %46, %47, %cst_23 {dimension_numbers = #tpu.dot_dimension_numbers<[1], [0], [0], [1], [0, 0, 1, 1], [], []>} : vector<8x128xf32>, vector<128x128xf32>, vector<8x128xf32> -> vector<8x128xf32>
    %c0_24 = arith.constant 0 : index
    %c0_25 = arith.constant 0 : index
    %49 = vector.load %arg5[%c0_24, %c0_25] : memref<1x128xf32, #tpu.memory_space<vmem>>, vector<1x128xf32>
    %50 = vector.broadcast %49 : vector<1x128xf32> to vector<8x128xf32>
    %51 = arith.addf %48, %50 : vector<8x128xf32>
    %c0_26 = arith.constant 0 : index
    %c0_27 = arith.constant 0 : index
    %52 = vector.load %arg6[%c0_26, %c0_27] : memref<8x128xf32, #tpu.memory_space<vmem>>, vector<8x128xf32>
    tpu.vector_store %arg6[%c0_26, %c0_27], %51 {strides = array<i32>} : memref<8x128xf32, #tpu.memory_space<vmem>>, vector<8x128xf32>,
    return
  }
  func.func @transform_0(%arg0: i32) -> (i32, i32) {
    %c0_i32 = arith.constant 0 : i32
    %c0_i32_0 = arith.constant 0 : i32
    return %arg0, %c0_i32 : i32, i32
  }
  func.func @transform_1(%arg0: i32) -> (i32, i32) {
    %c0_i32 = arith.constant 0 : i32
    %c0_i32_0 = arith.constant 0 : i32
    %c0_i32_1 = arith.constant 0 : i32
    return %c0_i32, %c0_i32_0 : i32, i32
  }
  func.func @transform_2(%arg0: i32) -> (i32, i32) {
    %c0_i32 = arith.constant 0 : i32
    %c0_i32_0 = arith.constant 0 : i32
    %c0_i32_1 = arith.constant 0 : i32
    return %c0_i32, %c0_i32_0 : i32, i32
  }
  func.func @transform_3(%arg0: i32) -> (i32, i32) {
    %c0_i32 = arith.constant 0 : i32
    %c0_i32_0 = arith.constant 0 : i32
    %c0_i32_1 = arith.constant 0 : i32
    return %c0_i32, %c0_i32_0 : i32, i32
  }
  func.func @transform_4(%arg0: i32) -> (i32, i32) {
    %c0_i32 = arith.constant 0 : i32
    %c0_i32_0 = arith.constant 0 : i32
    %c0_i32_1 = arith.constant 0 : i32
    return %c0_i32, %c0_i32_0 : i32, i32
  }
  func.func @transform_5(%arg0: i32) -> (i32, i32) {
    %c0_i32 = arith.constant 0 : i32
    %c0_i32_0 = arith.constant 0 : i32
    return %arg0, %c0_i32 : i32, i32
  }
}

</mosaic_0001>

<bundles_post_ra>
// kernel: tpu_custom_call.1
= control target key start
LH: loop header
LB: loop body
LE: loop exit
PB: predicated region body
PF: predicated region fallthrough
CT: control target
= control target key end

     0   :  { %10 = vsyncpa [#allocation3], 0  ;;  %s532_s0 = inlined_call_operand.hbm [shape: f32[8,32], index: 0, kind: input, shape index: {}]   ;;  %s533_s1 = inlined_call_operand.hbm [shape: f32[32,128], index: 1, kind: input, shape index: {}]   ;;  %s534_s2 = inlined_call_operand.vmem [shape: f32[1,128], index: 2, kind: input, shape index: {}]   ;;  %s535_s3 = inlined_call_operand.hbm [shape: f32[128,128], index: 3, kind: input, shape index: {}]   ;;  %s536_s4 = inlined_call_operand.vmem [shape: f32[1,128], index: 4, kind: input, shape index: {}]   ;;  %s537_s5 = inlined_call_operand.hbm [shape: f32[8,128], index: 5, kind: output, shape index: {}]  }
   0x1   :  { %11 = vsyncpa [#allocation6], 0 }
   0x2   :  { %12 = vsyncpa [#allocation4], 0  ;;  %s453_s18 = smov [#allocation5]  }
   0x3   :  { %s28_s19 = sshll.u32 %s453_s18, 4  ;;  %s29_s19 = int_to_ptr.vmem [resolvable:$true] %s28_s19 }
   0x4   :  { %s375_s20 = scalar_lea.vmem %s29_s19, 512  ;;  %p380_p1 = scmp.lt.s32.totalorder %s29_s19, %s29_s19 }
   0x5   :  { %p376_p0 = scmp.ne.s32.totalorder %s29_s19, %s375_s20  ;;  %p381_p2 = scmp.lt.s32.totalorder %s375_s20, %s375_s20 }
   0x7   :  { %p382_p3 = por %p381_p2, %p380_p1 }
   0x9   :  { %p383_p4 = pnand %p382_p3, %p376_p0 }
   0xb   :  { %386 = shalt.err (!%p383_p4)
}
   0xc   :  { %s454_s21 = smov 128   ;;  %s455_s22 = smov 8  }
   0xd   :  { %34 = dma.hbm_to_vmem [thread:$0]  %s533_s1, 512, %s29_s19, [#allocation6], %s454_s21, %s454_s21, %s455_s22  }
   0xe   :  { %s456_s25 = smov [#allocation2]   ;;  %s457_s27 = smov [#allocation7]  }
   0xf   :  { %s19_s26 = sshll.u32 %s456_s25, 4  ;;  %s42_s28 = sshll.u32 %s457_s27, 4  ;;  %s20_s26 = int_to_ptr.vmem [resolvable:$true] %s19_s26  ;;  %s43_s28 = int_to_ptr.vmem [resolvable:$true] %s42_s28 }
  0x10   :  { %s395_s29 = scalar_lea.vmem %s20_s26, 128  ;;  %p400_p6 = scmp.lt.s32.totalorder %s20_s26, %s20_s26 }
  0x11   :  { %p396_p5 = scmp.ne.s32.totalorder %s20_s26, %s395_s29  ;;  %p401_p7 = scmp.lt.s32.totalorder %s395_s29, %s395_s29 }
  0x13   :  { %p402_p8 = por %p401_p7, %p400_p6 }
  0x15   :  { %p403_p9 = pnand %p402_p8, %p396_p5 }
  0x17   :  { %406 = shalt.err (!%p403_p9)
}
  0x18   :  { %22 = dma.hbm_to_vmem [thread:$0]  %s532_s0, 128, %s20_s26, [#allocation3]  }
  0x19   :  { %s415_s7 = scalar_lea.vmem %s43_s28, 2048  ;;  %p420_p11 = scmp.lt.s32.totalorder %s43_s28, %s43_s28 }
  0x1a   :  { %p416_p10 = scmp.ne.s32.totalorder %s43_s28, %s415_s7  ;;  %p421_p12 = scmp.lt.s32.totalorder %s415_s7, %s415_s7 }
  0x1c   :  { %p422_p13 = por %p421_p12, %p420_p11 }
  0x1e   :  { %p423_p0 = pnand %p422_p13, %p416_p10 }
  0x20   :  { %426 = shalt.err (!%p423_p0)
}
  0x21   :  { %48 = dma.hbm_to_vmem [thread:$0]  %s535_s3, 2048, %s43_s28, [#allocation6], %s454_s21, %s454_s21, %s455_s22  }
  0x22   :  { %447 = dma.done.wait [#allocation3], 128  }
  0x23   :  { %448 = vsyncadd [#allocation3], 4294967168 }
  0x24   :  { %449 = dma.done.wait [#allocation6], 2560  }
  0x25   :  { %450 = vsyncadd [#allocation6], 4294964736  ;;  %v458_v0 = vmov 0.0   ;;  %vm459_vm0 = vmmov 0   ;;  %v64_v1 = vld [vmem:[#allocation5 + $0x18] sm:$0xff]  ;;  %v63_v2 = vld [vmem:[#allocation5 + $0x10] sm:$0xff] }
  0x26   :  { %308 = vmatprep.subr.mxu0 %v458_v0  ;;  %316 = vmatprep.mubr.msk.f32.mxu0 %vm459_vm0, %v458_v0  ;;  %v62_v3 = vld [vmem:[#allocation5 + $0x8] sm:$0xff]  ;;  %v61_v4 = vld [vmem:[#allocation5] sm:$0xff]  ;;  %v60_v5 = vld [vmem:[#allocation2] sm:$0xff]  ;;  %vm72_vm1 = vcmask 261120   ;;  %v460_v46 = vmov -1.0   ;;  %s461_s10 = smov [#allocation8]  }
  0x27   :  { %319 = vmatprep.subr.mxu1 %v458_v0  ;;  %351 = vmatprep.mubr.msk.f32.mxu1 %vm459_vm0, %v458_v0  ;;  %v188_v6 = vld [vmem:[#allocation7 + $0x78] sm:$0xff]  ;;  %v187_v7 = vld [vmem:[#allocation7 + $0x70] sm:$0xff]  ;;  %v186_v8 = vld [vmem:[#allocation7 + $0x68] sm:$0xff]  ;;  %s273_s11 = sshll.u32 %s461_s10, 4  ;;  %s274_s11 = int_to_ptr.vmem [resolvable:$true] %s273_s11 }
  0x28   :  { %309 = vmatpush3.msra.mxu0 %v64_v1  ;;  %320 = vmatpush3.msra.mxu1 %v188_v6  ;;  %v185_v9 = vld [vmem:[#allocation7 + $0x60] sm:$0xff]  ;;  %v184_v10 = vld [vmem:[#allocation7 + $0x58] sm:$0xff]  ;;  %v183_v11 = vld [vmem:[#allocation7 + $0x50] sm:$0xff]  ;;  %s427_s12 = scalar_lea.vmem %s274_s11, 128  ;;  %p432_p2 = scmp.lt.s32.totalorder %s274_s11, %s274_s11 }
  0x29   :  { %310 = vmatprep.subr.mxu0 %v458_v0  ;;  %321 = vmatprep.subr.mxu1 %v458_v0  ;;  %v182_v12 = vld [vmem:[#allocation7 + $0x48] sm:$0xff]  ;;  %v181_v13 = vld [vmem:[#allocation7 + $0x40] sm:$0xff]  ;;  %v180_v14 = vld [vmem:[#allocation7 + $0x38] sm:$0xff]  ;;  %p428_p1 = scmp.ne.s32.totalorder %s274_s11, %s427_s12  ;;  %p433_p3 = scmp.lt.s32.totalorder %s427_s12, %s427_s12 }
  0x2a   :  { %311 = vmatpush3.msra.mxu0 %v63_v2  ;;  %322 = vmatpush3.msra.mxu1 %v187_v7  ;;  %v179_v15 = vld [vmem:[#allocation7 + $0x30] sm:$0xff]  ;;  %v178_v16 = vld [vmem:[#allocation7 + $0x28] sm:$0xff]  ;;  %v177_v17 = vld [vmem:[#allocation7 + $0x20] sm:$0xff] }
  0x2b   :  { %312 = vmatprep.subr.mxu0 %v458_v0  ;;  %323 = vmatprep.subr.mxu1 %v458_v0  ;;  %v176_v18 = vld [vmem:[#allocation7 + $0x18] sm:$0xff]  ;;  %v175_v19 = vld [vmem:[#allocation7 + $0x10] sm:$0xff]  ;;  %v174_v20 = vld [vmem:[#allocation7 + $0x8] sm:$0xff]  ;;  %p434_p4 = por %p433_p3, %p432_p2 }
  0x2c   :  { %313 = vmatpush3.msra.mxu0 %v62_v3  ;;  %324 = vmatpush3.msra.mxu1 %v186_v8  ;;  %v173_v21 = vld [vmem:[#allocation7] sm:$0xff]  ;;  %v283_v22 = vld [vmem:[%s534_s2] ss:$0 sm:$0xff] }
  0x2d   :  { %314 = vmatprep.subr.mxu0 %v458_v0  ;;  %325 = vmatprep.subr.mxu1 %v458_v0  ;;  %v285_v52 = vld [vmem:[%s536_s4] ss:$0 sm:$0xff]  ;;  %p435_p5 = pnand %p434_p4, %p428_p1 }
  0x2e   :  { %315 = vmatpush3.msra.mxu0 %v61_v4  ;;  %326 = vmatpush3.msra.mxu1 %v185_v9 }
  0x2f   :  { %317 = vmatmul.mubr.msk.f32.vlgmr.msra.gmra.mxu0 %vm72_vm1, %v60_v5  ;;  %327 = vmatprep.subr.mxu1 %v458_v0 }
  0x30   :  { %328 = vmatpush3.msra.mxu1 %v184_v10 }
  0x31   :  { %329 = vmatprep.subr.mxu1 %v458_v0 }
  0x32   :  { %330 = vmatpush3.msra.mxu1 %v183_v11 }
  0x33   :  { %331 = vmatprep.subr.mxu1 %v458_v0 }
  0x34   :  { %332 = vmatpush3.msra.mxu1 %v182_v12 }
  0x35   :  { %333 = vmatprep.subr.mxu1 %v458_v0 }
  0x36   :  { %334 = vmatpush3.msra.mxu1 %v181_v13 }
  0x37   :  { %335 = vmatprep.subr.mxu1 %v458_v0 }
  0x38   :  { %336 = vmatpush3.msra.mxu1 %v180_v14 }
  0x39   :  { %337 = vmatprep.subr.mxu1 %v458_v0 }
  0x3a   :  { %338 = vmatpush3.msra.mxu1 %v179_v15 }
  0x3b   :  { %339 = vmatprep.subr.mxu1 %v458_v0 }
  0x3c   :  { %340 = vmatpush3.msra.mxu1 %v178_v16 }
  0x3d   :  { %341 = vmatprep.subr.mxu1 %v458_v0 }
  0x3e   :  { %342 = vmatpush3.msra.mxu1 %v177_v17 }
  0x3f   :  { %343 = vmatprep.subr.mxu1 %v458_v0 }
  0x40   :  { %344 = vmatpush3.msra.mxu1 %v176_v18 }
  0x41   :  { %345 = vmatprep.subr.mxu1 %v458_v0 }
  0x42   :  { %346 = vmatpush3.msra.mxu1 %v175_v19 }
  0x43   :  { %347 = vmatprep.subr.mxu1 %v458_v0 }
  0x44   :  { %348 = vmatpush3.msra.mxu1 %v174_v20 }
  0x45   :  { %349 = vmatprep.subr.mxu1 %v458_v0 }
  0x46   :  { %350 = vmatpush3.msra.mxu1 %v173_v21 }
  0xef   :  { %v142_v23 = vpop.f32.mrf.mxu0 }
  0xf0   :  { %v143_v24 = vadd.f32 %v283_v22, %v142_v23 }
  0xf1   :  { %v318_v25 = vpop.f32.mrf.mxu0 }
  0xf2   :  { %v147_v26 = vmul.f32 0.70710677, %v143_v24  ;;  %v146_v49 = vmul.f32 0.5, %v143_v24 }
  0xf4   :  { %v150_v27 = vand.u32 2147483647, %v147_v26  ;;  %vm148_vm2 = vcmp.ge.f32.partialorder %v147_v26, 0.0 }
  0xf5   :  { %v149_v47 = vsel %vm148_vm2, 1.0, %v460_v46 }
  0xf6   :  { %v151_v28 = vmul.f32 0.3275911, %v150_v27  ;;  %v164_v30 = vsub.f32 0.0, %v150_v27 }
  0xf8   :  { %v152_v29 = vadd.f32 1.0, %v151_v28  ;;  %v165_v31 = vmul.f32 %v164_v30, %v150_v27 }
  0xfa   :  { %363 = vrcp.f32 %v152_v29  ;;  %v166_v33 = vmul.f32 1.442695, %v165_v31 }
  0xfc   :  { %365 = vpow2.f32 %v166_v33 }
 0x107   :  { %v364_v32 = vpop.eup %363 }
 0x108   :  { %v155_v34 = vmul.f32 1.0614054, %v364_v32 }
 0x109   :  { %v366_v43 = vpop.eup %365 }
 0x10a   :  { %v156_v35 = vadd.f32 -1.4531521, %v155_v34 }
 0x10c   :  { %v157_v36 = vmul.f32 %v364_v32, %v156_v35 }
 0x10e   :  { %v158_v37 = vadd.f32 1.4214138, %v157_v36 }
 0x110   :  { %v159_v38 = vmul.f32 %v364_v32, %v158_v37 }
 0x112   :  { %v160_v39 = vadd.f32 -0.28449672, %v159_v38 }
 0x114   :  { %v161_v40 = vmul.f32 %v364_v32, %v160_v39 }
 0x116   :  { %v162_v41 = vadd.f32 0.2548296, %v161_v40 }
 0x118   :  { %v163_v42 = vmul.f32 %v364_v32, %v162_v41 }
 0x11a   :  { %v168_v44 = vmul.f32 %v366_v43, %v163_v42 }
 0x11c   :  { %v169_v45 = vsub.f32 1.0, %v168_v44 }
 0x11e   :  { %v170_v48 = vmul.f32 %v169_v45, %v149_v47 }
 0x120   :  { %v171_v50 = vadd.f32 1.0, %v170_v48 }
 0x122   :  { %v172_v51 = vmul.f32 %v171_v50, %v146_v49 }
 0x124   :  { %352 = vmatmul.mubr.f32.vlgmr.msra.gmra.mxu1 %v172_v51 }
 0x1e4   :  { %v262_v53 = vpop.f32.mrf.mxu1 }
 0x1e5   :  { %v263_v54 = vadd.f32 %v285_v52, %v262_v53 }
 0x1e6   :  { %v353_v55 = vpop.f32.mrf.mxu1 }
 0x1e7   :  { %266 = vst [vmem:[#allocation8] sm:$0xff] %v263_v54 }
 0x1e8   :  { %438 = shalt.err (!%p435_p5)
}
 0x1e9   :  { %276 = dma.vmem_to_hbm [thread:$0]  %s274_s11, 128, %s537_s5, [#allocation4]  }
 0x1ea   :  { %451 = dma.done.wait [#allocation4], 128  }
 0x1eb   :  { %452 = vsyncadd [#allocation4], 4294967168 }
 0x1ec   :  { %280 = vsyncpa [#allocation3], 1 }
 0x1ed   :  { %281 = vsyncpa [#allocation6], 1 }
 0x1ee   :  { %282 = vsyncpa [#allocation4], 1 }

// kernel: tpu_custom_call.1
= control target key start
LH: loop header
LB: loop body
LE: loop exit
PB: predicated region body
PF: predicated region fallthrough
CT: control target
= control target key end

     0   :  { %10 = vsyncpa [#allocation3], 0  ;;  %s532_s0 = inlined_call_operand.hbm [shape: f32[8,32], index: 0, kind: input, shape index: {}]   ;;  %s533_s1 = inlined_call_operand.hbm [shape: f32[32,128], index: 1, kind: input, shape index: {}]   ;;  %s534_s2 = inlined_call_operand.vmem [shape: f32[1,128], index: 2, kind: input, shape index: {}]   ;;  %s535_s3 = inlined_call_operand.hbm [shape: f32[128,128], index: 3, kind: input, shape index: {}]   ;;  %s536_s4 = inlined_call_operand.vmem [shape: f32[1,128], index: 4, kind: input, shape index: {}]   ;;  %s537_s5 = inlined_call_operand.hbm [shape: f32[8,128], index: 5, kind: output, shape index: {}]  }
   0x1   :  { %11 = vsyncpa [#allocation6], 0 }
   0x2   :  { %12 = vsyncpa [#allocation4], 0  ;;  %s453_s18 = smov [#allocation5]  }
   0x3   :  { %s28_s19 = sshll.u32 %s453_s18, 4  ;;  %s29_s19 = int_to_ptr.vmem [resolvable:$true] %s28_s19 }
   0x4   :  { %s375_s20 = scalar_lea.vmem %s29_s19, 512  ;;  %p380_p1 = scmp.lt.s32.totalorder %s29_s19, %s29_s19 }
   0x5   :  { %p376_p0 = scmp.ne.s32.totalorder %s29_s19, %s375_s20  ;;  %p381_p2 = scmp.lt.s32.totalorder %s375_s20, %s375_s20 }
   0x7   :  { %p382_p3 = por %p381_p2, %p380_p1 }
   0x9   :  { %p383_p4 = pnand %p382_p3, %p376_p0 }
   0xb   :  { %386 = shalt.err (!%p383_p4)
}
   0xc   :  { %s454_s21 = smov 128   ;;  %s455_s22 = smov 8  }
   0xd   :  { %34 = dma.hbm_to_vmem [thread:$0]  %s533_s1, 512, %s29_s19, [#allocation6], %s454_s21, %s454_s21, %s455_s22  }
   0xe   :  { %s456_s25 = smov [#allocation2]   ;;  %s457_s27 = smov [#allocation7]  }
   0xf   :  { %s19_s26 = sshll.u32 %s456_s25, 4  ;;  %s42_s28 = sshll.u32 %s457_s27, 4  ;;  %s20_s26 = int_to_ptr.vmem [resolvable:$true] %s19_s26  ;;  %s43_s28 = int_to_ptr.vmem [resolvable:$true] %s42_s28 }
  0x10   :  { %s395_s29 = scalar_lea.vmem %s20_s26, 128  ;;  %p400_p6 = scmp.lt.s32.totalorder %s20_s26, %s20_s26 }
  0x11   :  { %p396_p5 = scmp.ne.s32.totalorder %s20_s26, %s395_s29  ;;  %p401_p7 = scmp.lt.s32.totalorder %s395_s29, %s395_s29 }
  0x13   :  { %p402_p8 = por %p401_p7, %p400_p6 }
  0x15   :  { %p403_p9 = pnand %p402_p8, %p396_p5 }
  0x17   :  { %406 = shalt.err (!%p403_p9)
}
  0x18   :  { %22 = dma.hbm_to_vmem [thread:$0]  %s532_s0, 128, %s20_s26, [#allocation3]  }
  0x19   :  { %s415_s7 = scalar_lea.vmem %s43_s28, 2048  ;;  %p420_p11 = scmp.lt.s32.totalorder %s43_s28, %s43_s28 }
  0x1a   :  { %p416_p10 = scmp.ne.s32.totalorder %s43_s28, %s415_s7  ;;  %p421_p12 = scmp.lt.s32.totalorder %s415_s7, %s415_s7 }
  0x1c   :  { %p422_p13 = por %p421_p12, %p420_p11 }
  0x1e   :  { %p423_p0 = pnand %p422_p13, %p416_p10 }
  0x20   :  { %426 = shalt.err (!%p423_p0)
}
  0x21   :  { %48 = dma.hbm_to_vmem [thread:$0]  %s535_s3, 2048, %s43_s28, [#allocation6], %s454_s21, %s454_s21, %s455_s22  }
  0x22   :  { %447 = dma.done.wait [#allocation3], 128  }
  0x23   :  { %448 = vsyncadd [#allocation3], 4294967168 }
  0x24   :  { %449 = dma.done.wait [#allocation6], 2560  }
  0x25   :  { %450 = vsyncadd [#allocation6], 4294964736  ;;  %v458_v0 = vmov 0.0   ;;  %vm459_vm0 = vmmov 0   ;;  %v64_v1 = vld [vmem:[#allocation5 + $0x18] sm:$0xff]  ;;  %v63_v2 = vld [vmem:[#allocation5 + $0x10] sm:$0xff] }
  0x26   :  { %308 = vmatprep.subr.mxu0 %v458_v0  ;;  %316 = vmatprep.mubr.msk.f32.mxu0 %vm459_vm0, %v458_v0  ;;  %v62_v3 = vld [vmem:[#allocation5 + $0x8] sm:$0xff]  ;;  %v61_v4 = vld [vmem:[#allocation5] sm:$0xff]  ;;  %v60_v5 = vld [vmem:[#allocation2] sm:$0xff]  ;;  %vm72_vm1 = vcmask 261120   ;;  %v460_v46 = vmov -1.0   ;;  %s461_s10 = smov [#allocation8]  }
  0x27   :  { %319 = vmatprep.subr.mxu1 %v458_v0  ;;  %351 = vmatprep.mubr.msk.f32.mxu1 %vm459_vm0, %v458_v0  ;;  %v188_v6 = vld [vmem:[#allocation7 + $0x78] sm:$0xff]  ;;  %v187_v7 = vld [vmem:[#allocation7 + $0x70] sm:$0xff]  ;;  %v186_v8 = vld [vmem:[#allocation7 + $0x68] sm:$0xff]  ;;  %s273_s11 = sshll.u32 %s461_s10, 4  ;;  %s274_s11 = int_to_ptr.vmem [resolvable:$true] %s273_s11 }
  0x28   :  { %309 = vmatpush3.msra.mxu0 %v64_v1  ;;  %320 = vmatpush3.msra.mxu1 %v188_v6  ;;  %v185_v9 = vld [vmem:[#allocation7 + $0x60] sm:$0xff]  ;;  %v184_v10 = vld [vmem:[#allocation7 + $0x58] sm:$0xff]  ;;  %v183_v11 = vld [vmem:[#allocation7 + $0x50] sm:$0xff]  ;;  %s427_s12 = scalar_lea.vmem %s274_s11, 128  ;;  %p432_p2 = scmp.lt.s32.totalorder %s274_s11, %s274_s11 }
  0x29   :  { %310 = vmatprep.subr.mxu0 %v458_v0  ;;  %321 = vmatprep.subr.mxu1 %v458_v0  ;;  %v182_v12 = vld [vmem:[#allocation7 + $0x48] sm:$0xff]  ;;  %v181_v13 = vld [vmem:[#allocation7 + $0x40] sm:$0xff]  ;;  %v180_v14 = vld [vmem:[#allocation7 + $0x38] sm:$0xff]  ;;  %p428_p1 = scmp.ne.s32.totalorder %s274_s11, %s427_s12  ;;  %p433_p3 = scmp.lt.s32.totalorder %s427_s12, %s427_s12 }
  0x2a   :  { %311 = vmatpush3.msra.mxu0 %v63_v2  ;;  %322 = vmatpush3.msra.mxu1 %v187_v7  ;;  %v179_v15 = vld [vmem:[#allocation7 + $0x30] sm:$0xff]  ;;  %v178_v16 = vld [vmem:[#allocation7 + $0x28] sm:$0xff]  ;;  %v177_v17 = vld [vmem:[#allocation7 + $0x20] sm:$0xff] }
  0x2b   :  { %312 = vmatprep.subr.mxu0 %v458_v0  ;;  %323 = vmatprep.subr.mxu1 %v458_v0  ;;  %v176_v18 = vld [vmem:[#allocation7 + $0x18] sm:$0xff]  ;;  %v175_v19 = vld [vmem:[#allocation7 + $0x10] sm:$0xff]  ;;  %v174_v20 = vld [vmem:[#allocation7 + $0x8] sm:$0xff]  ;;  %p434_p4 = por %p433_p3, %p432_p2 }
  0x2c   :  { %313 = vmatpush3.msra.mxu0 %v62_v3  ;;  %324 = vmatpush3.msra.mxu1 %v186_v8  ;;  %v173_v21 = vld [vmem:[#allocation7] sm:$0xff]  ;;  %v283_v22 = vld [vmem:[%s534_s2] ss:$0 sm:$0xff] }
  0x2d   :  { %314 = vmatprep.subr.mxu0 %v458_v0  ;;  %325 = vmatprep.subr.mxu1 %v458_v0  ;;  %v285_v52 = vld [vmem:[%s536_s4] ss:$0 sm:$0xff]  ;;  %p435_p5 = pnand %p434_p4, %p428_p1 }
  0x2e   :  { %315 = vmatpush3.msra.mxu0 %v61_v4  ;;  %326 = vmatpush3.msra.mxu1 %v185_v9 }
  0x2f   :  { %317 = vmatmul.mubr.msk.f32.vlgmr.msra.gmra.mxu0 %vm72_vm1, %v60_v5  ;;  %327 = vmatprep.subr.mxu1 %v458_v0 }
  0x30   :  { %328 = vmatpush3.msra.mxu1 %v184_v10 }
  0x31   :  { %329 = vmatprep.subr.mxu1 %v458_v0 }
  0x32   :  { %330 = vmatpush3.msra.mxu1 %v183_v11 }
  0x33   :  { %331 = vmatprep.subr.mxu1 %v458_v0 }
  0x34   :  { %332 = vmatpush3.msra.mxu1 %v182_v12 }
  0x35   :  { %333 = vmatprep.subr.mxu1 %v458_v0 }
  0x36   :  { %334 = vmatpush3.msra.mxu1 %v181_v13 }
  0x37   :  { %335 = vmatprep.subr.mxu1 %v458_v0 }
  0x38   :  { %336 = vmatpush3.msra.mxu1 %v180_v14 }
  0x39   :  { %337 = vmatprep.subr.mxu1 %v458_v0 }
  0x3a   :  { %338 = vmatpush3.msra.mxu1 %v179_v15 }
  0x3b   :  { %339 = vmatprep.subr.mxu1 %v458_v0 }
  0x3c   :  { %340 = vmatpush3.msra.mxu1 %v178_v16 }
  0x3d   :  { %341 = vmatprep.subr.mxu1 %v458_v0 }
  0x3e   :  { %342 = vmatpush3.msra.mxu1 %v177_v17 }
  0x3f   :  { %343 = vmatprep.subr.mxu1 %v458_v0 }
  0x40   :  { %344 = vmatpush3.msra.mxu1 %v176_v18 }
  0x41   :  { %345 = vmatprep.subr.mxu1 %v458_v0 }
  0x42   :  { %346 = vmatpush3.msra.mxu1 %v175_v19 }
  0x43   :  { %347 = vmatprep.subr.mxu1 %v458_v0 }
  0x44   :  { %348 = vmatpush3.msra.mxu1 %v174_v20 }
  0x45   :  { %349 = vmatprep.subr.mxu1 %v458_v0 }
  0x46   :  { %350 = vmatpush3.msra.mxu1 %v173_v21 }
  0xef   :  { %v142_v23 = vpop.f32.mrf.mxu0 }
  0xf0   :  { %v143_v24 = vadd.f32 %v283_v22, %v142_v23 }
  0xf1   :  { %v318_v25 = vpop.f32.mrf.mxu0 }
  0xf2   :  { %v147_v26 = vmul.f32 0.70710677, %v143_v24  ;;  %v146_v49 = vmul.f32 0.5, %v143_v24 }
  0xf4   :  { %v150_v27 = vand.u32 2147483647, %v147_v26  ;;  %vm148_vm2 = vcmp.ge.f32.partialorder %v147_v26, 0.0 }
  0xf5   :  { %v149_v47 = vsel %vm148_vm2, 1.0, %v460_v46 }
  0xf6   :  { %v151_v28 = vmul.f32 0.3275911, %v150_v27  ;;  %v164_v30 = vsub.f32 0.0, %v150_v27 }
  0xf8   :  { %v152_v29 = vadd.f32 1.0, %v151_v28  ;;  %v165_v31 = vmul.f32 %v164_v30, %v150_v27 }
  0xfa   :  { %363 = vrcp.f32 %v152_v29  ;;  %v166_v33 = vmul.f32 1.442695, %v165_v31 }
  0xfc   :  { %365 = vpow2.f32 %v166_v33 }
 0x107   :  { %v364_v32 = vpop.eup %363 }
 0x108   :  { %v155_v34 = vmul.f32 1.0614054, %v364_v32 }
 0x109   :  { %v366_v43 = vpop.eup %365 }
 0x10a   :  { %v156_v35 = vadd.f32 -1.4531521, %v155_v34 }
 0x10c   :  { %v157_v36 = vmul.f32 %v364_v32, %v156_v35 }
 0x10e   :  { %v158_v37 = vadd.f32 1.4214138, %v157_v36 }
 0x110   :  { %v159_v38 = vmul.f32 %v364_v32, %v158_v37 }
 0x112   :  { %v160_v39 = vadd.f32 -0.28449672, %v159_v38 }
 0x114   :  { %v161_v40 = vmul.f32 %v364_v32, %v160_v39 }
 0x116   :  { %v162_v41 = vadd.f32 0.2548296, %v161_v40 }
 0x118   :  { %v163_v42 = vmul.f32 %v364_v32, %v162_v41 }
 0x11a   :  { %v168_v44 = vmul.f32 %v366_v43, %v163_v42 }
 0x11c   :  { %v169_v45 = vsub.f32 1.0, %v168_v44 }
 0x11e   :  { %v170_v48 = vmul.f32 %v169_v45, %v149_v47 }
 0x120   :  { %v171_v50 = vadd.f32 1.0, %v170_v48 }
 0x122   :  { %v172_v51 = vmul.f32 %v171_v50, %v146_v49 }
 0x124   :  { %352 = vmatmul.mubr.f32.vlgmr.msra.gmra.mxu1 %v172_v51 }
 0x1e4   :  { %v262_v53 = vpop.f32.mrf.mxu1 }
 0x1e5   :  { %v263_v54 = vadd.f32 %v285_v52, %v262_v53 }
 0x1e6   :  { %v353_v55 = vpop.f32.mrf.mxu1 }
 0x1e7   :  { %266 = vst [vmem:[#allocation8] sm:$0xff] %v263_v54 }
 0x1e8   :  { %438 = shalt.err (!%p435_p5)
}
 0x1e9   :  { %276 = dma.vmem_to_hbm [thread:$0]  %s274_s11, 128, %s537_s5, [#allocation4]  }
 0x1ea   :  { %451 = dma.done.wait [#allocation4], 128  }
 0x1eb   :  { %452 = vsyncadd [#allocation4], 4294967168 }
 0x1ec   :  { %280 = vsyncpa [#allocation3], 1 }
 0x1ed   :  { %281 = vsyncpa [#allocation6], 1 }
 0x1ee   :  { %282 = vsyncpa [#allocation4], 1 }

</bundles_post_ra>
